<compile_context>
chip_gen: v6e
topology: v6e:2x2x1
jax: 0.10.0
libtpu: 0.0.40
codegen_flags: <defaults>
</compile_context>

<pallas_src>
import functools

import jax
import jax.numpy as jnp
from jax.experimental import pallas as pl
from jax.experimental.pallas import tpu as pltpu

LANE = 128


def _round_up(x, m):
    return ((x + m - 1) // m) * m


def _voting_kernel(koff_ref, kcnt_ref,                      # scalar-prefetch (SMEM)
                   x_ref, w1_ref, b1_ref, w2_ref, b2_ref,   # VMEM input tiles
                   o_ref,                                    # VMEM output tile
                   h_acc,                                    # VMEM f32 scratch
                   *, inv_num_heads):
    n = pl.program_id(0)          # modality ('parallel')
    k = pl.program_id(1)          # K tile of W1 (reduction, last, 'arbitrary')

    @pl.when(k == 0)
    def _():
        h_acc[...] = jnp.zeros_like(h_acc)

    # Heads with fewer K tiles than the grid extent skip their clamped blocks.
    @pl.when(k < kcnt_ref[n])
    def _():
        h_acc[...] += jnp.dot(x_ref[...], w1_ref[...],
                              preferred_element_type=jnp.float32)

    @pl.when(k == pl.num_programs(1) - 1)
    def _():
        # Elementwise math in f32; only MXU operands are bf16.
        h = jnp.maximum(h_acc[...] + b1_ref[0], 0.0)                 # (Bp, Hp) f32
        logits = jnp.dot(h.astype(w2_ref.dtype), w2_ref[0],
                         preferred_element_type=jnp.float32) + b2_ref[0]
        # 1/N mean factor folded into one fused multiply; lane-dense store.
        o_ref[0] = jax.nn.sigmoid(logits) * inv_num_heads            # (Bp, Cp)


def pack_voting_params(params, input_dims, class_num, *,
                       k_tile=512, lane=LANE, weight_dtype=jnp.bfloat16):
    """One-time (model-init) packing of the per-modality classification heads.

    params: list of (W1, b1, W2, b2) in PyTorch nn.Linear layout (W: (out, in),
    y = x @ W.T + b).  Each head i is padded INDEPENDENTLY:
      * input/K dim  D_i -> Dp_i = round_up(D_i, k_tile)      (per-head, not max-D)
      * hidden dim        -> H_pad = round_up(max D_i, lane)  (shared lane width)
      * class dim         -> Cp    = round_up(class_num, lane) (lane-dense output)
    Zero padding is exact through ReLU and Linear2 (padded rows/cols contribute
    nothing).  W1/W2 are stored in bf16; accumulation stays f32 in the kernel.
    """
    assert k_tile % lane == 0
    n_heads = len(input_dims)
    h_pad = _round_up(max(input_dims), lane)
    c_pad = _round_up(class_num, lane)
    d_pads = [_round_up(d, k_tile) for d in input_dims]

    w1_blocks, b1s, w2s, b2s, k_offsets = [], [], [], [], []
    off = 0
    for (w1, b1, w2, b2), d, dp in zip(params, input_dims, d_pads):
        k_offsets.append(off)
        off += dp // k_tile
        w1_blocks.append(jnp.pad(jnp.asarray(w1, jnp.float32).T,
                                 ((0, dp - d), (0, h_pad - d))).astype(weight_dtype))
        b1s.append(jnp.pad(jnp.asarray(b1, jnp.float32), (0, h_pad - d))[None, :])
        w2s.append(jnp.pad(jnp.asarray(w2, jnp.float32).T,
                           ((0, h_pad - d), (0, c_pad - class_num))).astype(weight_dtype))
        b2s.append(jnp.pad(jnp.asarray(b2, jnp.float32),
                           (0, c_pad - class_num))[None, :])

    k_counts = [dp // k_tile for dp in d_pads]
    return dict(
        w1=jnp.concatenate(w1_blocks, axis=0),          # (sum Dp_i, H_pad) bf16
        b1=jnp.stack(b1s),                               # (N, 1, H_pad)    f32
        w2=jnp.stack(w2s),                               # (N, H_pad, Cp)   bf16
        b2=jnp.stack(b2s),                               # (N, 1, Cp)       f32
        k_offsets=jnp.asarray(k_offsets, jnp.int32),     # (N,) tile-unit offsets
        k_counts=jnp.asarray(k_counts, jnp.int32),       # (N,) tiles per head
        k_max_tiles=max(k_counts),
        k_tile=k_tile, d_pads=tuple(d_pads), h_pad=h_pad, c_pad=c_pad,
        class_num=class_num, num_heads=n_heads,
    )


def predict_voting_fusion(features, packed, *, feature_dtype=jnp.bfloat16):
    """features: list of (B, D_i) arrays; packed: output of pack_voting_params.
    Returns (mean-of-sigmoid predictions (B, class_num), None)."""
    class_num = packed["class_num"]
    h_pad, c_pad = packed["h_pad"], packed["c_pad"]
    d_pads, k_tile = packed["d_pads"], packed["k_tile"]
    n_heads, k_max = packed["num_heads"], packed["k_max_tiles"]

    B = features[0].shape[0]
    b_pad = _round_up(max(B, 1), 16)   # bf16 LHS packs 16 sublanes per vreg

    # Per-call feature packing: per-head padding only, concatenated along K.
    xs = [jnp.pad(jnp.asarray(f, jnp.float32),
                  ((0, b_pad - B), (0, dp - f.shape[1]))).astype(feature_dtype)
          for f, dp in zip(features, d_pads)]
    x = jnp.concatenate(xs, axis=1)                      # (Bp, sum Dp_i)

    def _k_index(n, k, koff, kcnt):
        # Clamp K-tile index into this head's range (extra steps skipped in-kernel).
        return koff[n] + jnp.minimum(k, kcnt[n] - 1)

    grid_spec = pltpu.PrefetchScalarGridSpec(
        num_scalar_prefetch=2,
        grid=(n_heads, k_max),
        in_specs=[
            pl.BlockSpec((b_pad, k_tile),
                         lambda n, k, koff, kcnt: (0, _k_index(n, k, koff, kcnt))),
            pl.BlockSpec((k_tile, h_pad),
                         lambda n, k, koff, kcnt: (_k_index(n, k, koff, kcnt), 0)),
            pl.BlockSpec((1, 1, h_pad), lambda n, k, koff, kcnt: (n, 0, 0)),
            pl.BlockSpec((1, h_pad, c_pad), lambda n, k, koff, kcnt: (n, 0, 0)),
            pl.BlockSpec((1, 1, c_pad), lambda n, k, koff, kcnt: (n, 0, 0)),
        ],
        out_specs=pl.BlockSpec((1, b_pad, c_pad), lambda n, k, koff, kcnt: (n, 0, 0)),
        scratch_shapes=[pltpu.VMEM((b_pad, h_pad), jnp.float32)],
    )

    out = pl.pallas_call(
        functools.partial(_voting_kernel, inv_num_heads=1.0 / n_heads),
        grid_spec=grid_spec,
        out_shape=jax.ShapeDtypeStruct((n_heads, b_pad, c_pad), jnp.float32),
        compiler_params=pltpu.CompilerParams(
            dimension_semantics=("parallel", "arbitrary"),
            vmem_limit_bytes=48 * 1024 * 1024,
        ),
    )(packed["k_offsets"], packed["k_counts"], x,
      packed["w1"], packed["b1"], packed["w2"], packed["b2"])

    # Each modality wrote sigmoid(head_i(x_i))/N into its own lane-dense block;
    # the cross-modality combine is a trivial (N, Bp, Cp) sum, then padding
    # (batch rows, class cols = 0.5/N) is sliced away.
    voting = jnp.sum(out, axis=0)[:B, :class_num]
    return voting, None


def _ref_forward(features, params):
    preds = []
    for f, (w1, b1, w2, b2) in zip(features, params):
        h = jnp.maximum(f @ w1.T + b1, 0.0)
        preds.append(jax.nn.sigmoid(h @ w2.T + b2))
    return jnp.mean(jnp.stack(preds, axis=-1), axis=-1)


if __name__ == "__main__":
    key = jax.random.PRNGKey(0)
    input_dim = (32, 48, 64)   # three modalities with different feature dims
    class_num = 4
    B = 8

    # deterministic synthetic parameters (PyTorch Linear layout: W (out, in))
    params, features = [], []
    for d in input_dim:
        key, k1, k2, k3, k4, kx = jax.random.split(key, 6)
        w1 = 0.1 * jax.random.normal(k1, (d, d), jnp.float32)
        b1 = 0.1 * jax.random.normal(k2, (d,), jnp.float32)
        w2 = 0.1 * jax.random.normal(k3, (class_num, d), jnp.float32)
        b2 = 0.1 * jax.random.normal(k4, (class_num,), jnp.float32)
        params.append((w1, b1, w2, b2))
        features.append(jax.random.normal(kx, (B, d), jnp.float32))

    # One-time packing (model init).  k_tile=128 keeps per-head padding minimal
    # at these toy dims; production sizes should use k_tile=512+ (v6e) /
    # 256-512 (v7x) for near-roofline weight streaming.
    packed = pack_voting_params(params, list(input_dim), class_num, k_tile=128)

    out, _ = predict_voting_fusion(features, packed)
    out = jax.block_until_ready(out)

    ref = _ref_forward(features, params)
    assert out.shape == (B, class_num)
    # bf16 matmul operands (f32 accumulation) vs pure-f32 reference.
    assert jnp.allclose(out, ref, atol=2e-2, rtol=2e-2), \
        float(jnp.max(jnp.abs(out - ref)))

    print("KERNEL_OK")
</pallas_src>

<mosaic_0001>
module attributes {stable_mosaic.version = 11 : i64} {
  func.func @_voting_kernel(%arg0: i32, %arg1: i32, %arg2: memref<3xi32, #tpu.memory_space<smem>>, %arg3: memref<3xi32, #tpu.memory_space<smem>>, %arg4: memref<16x128xbf16, #tpu.memory_space<vmem>>, %arg5: memref<128x128xbf16, #tpu.memory_space<vmem>>, %arg6: memref<1x1x128xf32, #tpu.memory_space<vmem>>, %arg7: memref<1x128x128xbf16, #tpu.memory_space<vmem>>, %arg8: memref<1x1x128xf32, #tpu.memory_space<vmem>>, %arg9: memref<1x16x128xf32, #tpu.memory_space<vmem>>, %arg10: memref<16x128xf32, #tpu.memory_space<vmem>>) attributes {dimension_semantics = [#tpu.dimension_semantics<parallel>, #tpu.dimension_semantics<arbitrary>], iteration_bounds = array<i64: 3, 1>, scalar_prefetch = 2 : i64, scratch_operands = 1 : i64, tpu.core_type = #tpu.core_type<tc>, window_params = [{transform_indices = @transform_0, window_bounds = array<i64: 16, 128>}, {transform_indices = @transform_1, window_bounds = array<i64: 128, 128>}, {transform_indices = @transform_2, window_bounds = array<i64: 1, 1, 128>}, {transform_indices = @transform_3, window_bounds = array<i64: 1, 128, 128>}, {transform_indices = @transform_4, window_bounds = array<i64: 1, 1, 128>}, {transform_indices = @transform_5, window_bounds = array<i64: 1, 16, 128>}]} {
    %c0_i32 = arith.constant 0 : i32
    %0 = arith.cmpi eq, %arg1, %c0_i32 : i32
    %1 = arith.extui %0 : i1 to i32
    %c0_i32_0 = arith.constant 0 : i32
    %2 = arith.cmpi ne, %1, %c0_i32_0 : i32
    scf.if %2 {
      %cst = arith.constant 0.000000e+00 : f32
      %11 = vector.broadcast %cst : f32 to vector<16x128xf32>
      %c0 = arith.constant 0 : index
      %c0_4 = arith.constant 0 : index
      %12 = vector.load %arg10[%c0, %c0_4] : memref<16x128xf32, #tpu.memory_space<vmem>>, vector<16x128xf32>
      tpu.vector_store %arg10[%c0, %c0_4], %11 {strides = array<i32>} : memref<16x128xf32, #tpu.memory_space<vmem>>, vector<16x128xf32>,
    } else {
    }
    %3 = arith.index_cast %arg0 : i32 to index
    %4 = memref.load %arg3[%3] : memref<3xi32, #tpu.memory_space<smem>>
    %5 = arith.cmpi slt, %arg1, %4 : i32
    %6 = arith.extui %5 : i1 to i32
    %c0_i32_1 = arith.constant 0 : i32
    %7 = arith.cmpi ne, %6, %c0_i32_1 : i32
    scf.if %7 {
      %c0 = arith.constant 0 : index
      %c0_4 = arith.constant 0 : index
      %11 = vector.load %arg10[%c0, %c0_4] : memref<16x128xf32, #tpu.memory_space<vmem>>, vector<16x128xf32>
      %c0_5 = arith.constant 0 : index
      %c0_6 = arith.constant 0 : index
      %12 = vector.load %arg4[%c0_5, %c0_6] : memref<16x128xbf16, #tpu.memory_space<vmem>>, vector<16x128xbf16>
      %c0_7 = arith.constant 0 : index
      %c0_8 = arith.constant 0 : index
      %13 = vector.load %arg5[%c0_7, %c0_8] : memref<128x128xbf16, #tpu.memory_space<vmem>>, vector<128x128xbf16>
      %cst = arith.constant dense<0.000000e+00> : vector<16x128xf32>
      %14 = tpu.matmul %12, %13, %cst {dimension_numbers = #tpu.dot_dimension_numbers<[1], [0], [0], [1], [0, 0, 1, 1], [], []>} : vector<16x128xbf16>, vector<128x128xbf16>, vector<16x128xf32> -> vector<16x128xf32>
      %15 = arith.addf %11, %14 : vector<16x128xf32>
      %c0_9 = arith.constant 0 : index
      %c0_10 = arith.constant 0 : index
      %16 = vector.load %arg10[%c0_9, %c0_10] : memref<16x128xf32, #tpu.memory_space<vmem>>, vector<16x128xf32>
      tpu.vector_store %arg10[%c0_9, %c0_10], %15 {strides = array<i32>} : memref<16x128xf32, #tpu.memory_space<vmem>>, vector<16x128xf32>,
    } else {
    }
    %c0_i32_2 = arith.constant 0 : i32
    %8 = arith.cmpi eq, %arg1, %c0_i32_2 : i32
    %9 = arith.extui %8 : i1 to i32
    %c0_i32_3 = arith.constant 0 : i32
    %10 = arith.cmpi ne, %9, %c0_i32_3 : i32
    scf.if %10 {
      %c0 = arith.constant 0 : index
      %c0_4 = arith.constant 0 : index
      %11 = vector.load %arg10[%c0, %c0_4] : memref<16x128xf32, #tpu.memory_space<vmem>>, vector<16x128xf32>
      %c0_5 = arith.constant 0 : index
      %c0_6 = arith.constant 0 : index
      %c0_7 = arith.constant 0 : index
      %12 = vector.load %arg6[%c0_5, %c0_6, %c0_7] : memref<1x1x128xf32, #tpu.memory_space<vmem>>, vector<1x1x128xf32>
      %13 = vector.shape_cast %12 : vector<1x1x128xf32> to vector<1x128xf32>
      %14 = vector.broadcast %13 : vector<1x128xf32> to vector<16x128xf32>
      %15 = arith.addf %11, %14 : vector<16x128xf32>
      %cst = arith.constant 0.000000e+00 : f32
      %16 = vector.broadcast %cst : f32 to vector<16x128xf32>
      %17 = arith.maximumf %15, %16 : vector<16x128xf32>
      %18 = arith.truncf %17 : vector<16x128xf32> to vector<16x128xbf16>
      %c0_8 = arith.constant 0 : index
      %c0_9 = arith.constant 0 : index
      %c0_10 = arith.constant 0 : index
      %19 = vector.load %arg7[%c0_8, %c0_9, %c0_10] : memref<1x128x128xbf16, #tpu.memory_space<vmem>>, vector<1x128x128xbf16>
      %20 = vector.shape_cast %19 : vector<1x128x128xbf16> to vector<128x128xbf16>
      %cst_11 = arith.constant dense<0.000000e+00> : vector<16x128xf32>
      %21 = tpu.matmul %18, %20, %cst_11 {dimension_numbers = #tpu.dot_dimension_numbers<[1], [0], [0], [1], [0, 0, 1, 1], [], []>} : vector<16x128xbf16>, vector<128x128xbf16>, vector<16x128xf32> -> vector<16x128xf32>
      %c0_12 = arith.constant 0 : index
      %c0_13 = arith.constant 0 : index
      %c0_14 = arith.constant 0 : index
      %22 = vector.load %arg8[%c0_12, %c0_13, %c0_14] : memref<1x1x128xf32, #tpu.memory_space<vmem>>, vector<1x1x128xf32>
      %23 = vector.shape_cast %22 : vector<1x1x128xf32> to vector<1x128xf32>
      %24 = vector.broadcast %23 : vector<1x128xf32> to vector<16x128xf32>
      %25 = arith.addf %21, %24 : vector<16x128xf32>
      %26 = arith.negf %25 : vector<16x128xf32>
      %27 = math.exp %26 : vector<16x128xf32>
      %cst_15 = arith.constant 1.000000e+00 : f32
      %28 = vector.broadcast %cst_15 : f32 to vector<16x128xf32>
      %29 = arith.addf %28, %27 : vector<16x128xf32>
      %30 = arith.divf %28, %29 : vector<16x128xf32>
      %cst_16 = arith.constant 0.333333343 : f32
      %31 = vector.broadcast %cst_16 : f32 to vector<16x128xf32>
      %32 = arith.mulf %30, %31 : vector<16x128xf32>
      %c0_17 = arith.constant 0 : index
      %c0_18 = arith.constant 0 : index
      %c0_19 = arith.constant 0 : index
      %33 = vector.load %arg9[%c0_17, %c0_18, %c0_19] : memref<1x16x128xf32, #tpu.memory_space<vmem>>, vector<1x16x128xf32>
      %34 = vector.shape_cast %33 : vector<1x16x128xf32> to vector<16x128xf32>
      %35 = vector.shape_cast %32 : vector<16x128xf32> to vector<1x16x128xf32>
      tpu.vector_store %arg9[%c0_17, %c0_18, %c0_19], %35 {strides = array<i32>} : memref<1x16x128xf32, #tpu.memory_space<vmem>>, vector<1x16x128xf32>,
    } else {
    }
    return
  }
  func.func @transform_0(%arg0: i32, %arg1: i32, %arg2: memref<3xi32, #tpu.memory_space<smem>>, %arg3: memref<3xi32, #tpu.memory_space<smem>>) -> (i32, i32) {
    %0 = arith.index_cast %arg0 : i32 to index
    %1 = memref.load %arg2[%0] : memref<3xi32, #tpu.memory_space<smem>>
    %2 = arith.index_cast %arg0 : i32 to index
    %3 = memref.load %arg3[%2] : memref<3xi32, #tpu.memory_space<smem>>
    %c1_i32 = arith.constant 1 : i32
    %4 = arith.subi %3, %c1_i32 : i32
    %5 = arith.minsi %arg1, %4 : i32
    %6 = arith.addi %1, %5 : i32
    %c0_i32 = arith.constant 0 : i32
    %c0_i32_0 = arith.constant 0 : i32
    return %c0_i32, %6 : i32, i32
  }
  func.func @transform_1(%arg0: i32, %arg1: i32, %arg2: memref<3xi32, #tpu.memory_space<smem>>, %arg3: memref<3xi32, #tpu.memory_space<smem>>) -> (i32, i32) {
    %0 = arith.index_cast %arg0 : i32 to index
    %1 = memref.load %arg2[%0] : memref<3xi32, #tpu.memory_space<smem>>
    %2 = arith.index_cast %arg0 : i32 to index
    %3 = memref.load %arg3[%2] : memref<3xi32, #tpu.memory_space<smem>>
    %c1_i32 = arith.constant 1 : i32
    %4 = arith.subi %3, %c1_i32 : i32
    %5 = arith.minsi %arg1, %4 : i32
    %6 = arith.addi %1, %5 : i32
    %c0_i32 = arith.constant 0 : i32
    %c0_i32_0 = arith.constant 0 : i32
    return %6, %c0_i32 : i32, i32
  }
  func.func @transform_2(%arg0: i32, %arg1: i32, %arg2: memref<3xi32, #tpu.memory_space<smem>>, %arg3: memref<3xi32, #tpu.memory_space<smem>>) -> (i32, i32, i32) {
    %c0_i32 = arith.constant 0 : i32
    %c0_i32_0 = arith.constant 0 : i32
    %c0_i32_1 = arith.constant 0 : i32
    return %arg0, %c0_i32, %c0_i32_0 : i32, i32, i32
  }
  func.func @transform_3(%arg0: i32, %arg1: i32, %arg2: memref<3xi32, #tpu.memory_space<smem>>, %arg3: memref<3xi32, #tpu.memory_space<smem>>) -> (i32, i32, i32) {
    %c0_i32 = arith.constant 0 : i32
    %c0_i32_0 = arith.constant 0 : i32
    %c0_i32_1 = arith.constant 0 : i32
    return %arg0, %c0_i32, %c0_i32_0 : i32, i32, i32
  }
  func.func @transform_4(%arg0: i32, %arg1: i32, %arg2: memref<3xi32, #tpu.memory_space<smem>>, %arg3: memref<3xi32, #tpu.memory_space<smem>>) -> (i32, i32, i32) {
    %c0_i32 = arith.constant 0 : i32
    %c0_i32_0 = arith.constant 0 : i32
    %c0_i32_1 = arith.constant 0 : i32
    return %arg0, %c0_i32, %c0_i32_0 : i32, i32, i32
  }
  func.func @transform_5(%arg0: i32, %arg1: i32, %arg2: memref<3xi32, #tpu.memory_space<smem>>, %arg3: memref<3xi32, #tpu.memory_space<smem>>) -> (i32, i32, i32) {
    %c0_i32 = arith.constant 0 : i32
    %c0_i32_0 = arith.constant 0 : i32
    %c0_i32_1 = arith.constant 0 : i32
    return %arg0, %c0_i32, %c0_i32_0 : i32, i32, i32
  }
}

</mosaic_0001>

<bundles_post_ra>
// kernel: tpu_custom_call.1
= control target key start
LH: loop header
LB: loop body
LE: loop exit
PB: predicated region body
PF: predicated region fallthrough
CT: control target
= control target key end

     0   :  { %s1386_s24 = smov [#allocation4]   ;;  %s1925_s0 = inlined_call_operand.hbm [shape: s32[3], index: 0, kind: input, shape index: {}]   ;;  %s1926_s2 = inlined_call_operand.hbm [shape: bf16[16,384], index: 2, kind: input, shape index: {}]   ;;  %s1927_s3 = inlined_call_operand.hbm [shape: bf16[384,128], index: 3, kind: input, shape index: {}]   ;;  %s1928_s4 = inlined_call_operand.vmem [shape: f32[3,1,128], index: 4, kind: input, shape index: {}]   ;;  %s1929_s5 = inlined_call_operand.hbm [shape: bf16[3,128,128], index: 5, kind: input, shape index: {}]   ;;  %s1930_s6 = inlined_call_operand.vmem [shape: f32[3,1,128], index: 6, kind: input, shape index: {}]   ;;  %s1931_s7 = inlined_call_operand.hbm [shape: f32[3,16,128], index: 7, kind: output, shape index: {}]   ;;  %s1932_s1 = inlined_call_operand.vmem [shape: s32[3], index: 1, kind: input, shape index: {}]  }
   0x1   :  { %1954 = sst [smem:[#allocation34_spill]] %s1926_s2  ;;  %s14_s29 = sshll.u32 %s1932_s1, 4  ;;  %s15_s29 = int_to_ptr.vmem [resolvable:$true] %s14_s29 }
   0x2   :  { %1955 = sst [smem:[#allocation35_spill]] %s1927_s3  ;;  %s1150_s30 = scalar_lea.vmem %s15_s29, 16 }
   0x3   :  { %1956 = sst [smem:[#allocation36_spill]] %s1928_s4  ;;  %p1151_p0 = scmp.ne.s32.totalorder %s15_s29, %s1150_s30 }
   0x4   :  { %1957 = sst [smem:[#allocation37_spill]] %s1929_s5  ;;  %p1155_p1 = scmp.lt.s32.totalorder %s15_s29, %s15_s29 }
   0x5   :  { %1958 = sst [smem:[#allocation38_spill]] %s1930_s6  ;;  %p1156_p2 = scmp.lt.s32.totalorder %s1150_s30, %s1150_s30 }
   0x6   :  { %1959 = sst [smem:[#allocation39_spill]] %s1931_s7 }
   0x7   :  { %13 = dma.hbm_to_smem %s1925_s0, 16, %s1386_s24, [#allocation3] }
   0x8   :  { %p1157_p3 = por %p1156_p2, %p1155_p1 }
   0xa   :  { %p1158_p4 = pnand %p1157_p3, %p1151_p0 }
   0xc   :  { %1161 = shalt.err (!%p1158_p4)  }
   0xd   :  { %s1387_s8 = smov [#allocation5]  }
   0xe   :  { %17 = dma.vmem_to_smem %s15_s29, 16, %s1387_s8, [#allocation3] }
   0xf   :  { %1320 = dma.done.wait [#allocation3], 32 }
  0x10   :  { %1321 = vsyncadd [#allocation3], 4294967264 }
  0x11   :  { %19 = sfence }
  0x12   :  { %20 = vsyncpa [#allocation7], 0 }
  0x13   :  { %22 = vsyncpa [#allocation7 + $0x1], 0 }
  0x14   :  { %23 = vsyncpa [#allocation10], 0 }
  0x15   :  { %25 = vsyncpa [#allocation10 + $0x1], 0 }
  0x16   :  { %26 = vsyncpa [#allocation8], 0 }
  0x17   :  { %28 = vsyncpa [#allocation8 + $0x1], 0  ;;  %s1447_s0 = smov 0   ;;  %s1449_s1 = smov 0  }
  0x18   :  { %s1451_s9 = smov 0   ;;  %s1453_s10 = smov 0  }
  0x19   :  { %s1455_s11 = smov 0   ;;  %s1457_s12 = smov 0  }
  0x1a   :  { %s1459_s13 = smov 0   ;;  %s1461_s14 = smov 0  }
  0x1b   :  { %s1463_s15 = smov 0   ;;  %s1465_s16 = smov 0  }
  0x1c   :  { %s1467_s17 = smov 0   ;;  %s1469_s18 = smov 0  }
  0x1d LB: > { %1960 = sst [smem:[#allocation26_spill]] %s1356_s11  ;;  %s1506_s19 = sadd.s32 4294967295, %s1384_s18   ;;  %s1384_s18 = sphi %s1469_s18, %s34_s18   ;;  %s1380_s17 = sphi %s1467_s17, %s2031_s17   ;;  %s1376_s16 = sphi %s1465_s16, %s2030_s16   ;;  %s1372_s15 = sphi %s1463_s15, %s2029_s15   ;;  %s1368_s14 = sphi %s1461_s14, %s2028_s14   ;;  %s1364_s13 = sphi %s1459_s13, %s2027_s13   ;;  %s1360_s12 = sphi %s1457_s12, %s2021_s12   ;;  %s1356_s11 = sphi %s1455_s11, %s2020_s11   ;;  %s1352_s10 = sphi %s1453_s10, %s2019_s10   ;;  %s1348_s9 = sphi %s1451_s9, %s2026_s9   ;;  %s1344_s1 = sphi %s1449_s1, %s2025_s1   ;;  %s1340_s0 = sphi %s1447_s0, %s2024_s0  }
  0x1e   : > { %1961 = sst [smem:[#allocation27_spill]] %s1360_s12  ;;  %s46_s20 = sadd.s32 1, %s1380_s17 }
  0x1f   : > { %1962 = sst [smem:[#allocation28_spill]] %s1376_s16  ;;  %p48_p5 = scmp.ge.s32.totalorder %s46_s20, 3 }
  0x20   : > { %p1940_p6 = scmp.eq.s32.totalorder %s1384_s18, 0  ;;  %p1942_p7 = scmp.eq.s32.totalorder %s1506_s19, 0 }
  0x21   : > { %s88_s21 = sld [smem:[#allocation4 + %s1380_s17]]  ;;  %s2033_s20 = smov (%p48_p5, %s46_s20), 0 }
  0x22   : > { %1963 = sst [smem:[#allocation29_spill]] %s2033_s20  ;;  %s103_s23 = sadd.s32 1, %s1360_s12 }
  0x23   : > { %s89_s22 = sld [smem:[#allocation5 + %s1380_s17]]  ;;  %p110_p8 = scmp.ne.s32.totalorder %s1360_s12, %s1356_s11 }
  0x24   : > { %s94_s24 = sld [smem:[#allocation4 + %s2033_s20]]  ;;  %p116_p9 = scmp.ne.s32.totalorder %s1356_s11, %s1352_s10 }
  0x25   : > { %s95_s25 = sld [smem:[#allocation5 + %s2033_s20]]  ;;  %p1523_p10 = por %p110_p8, %p1940_p6 }
  0x26   : > { %p1529_p11 = por %p116_p9, %p1942_p7  ;;  %p1941_p12 = scmp.lt.s32.totalorder %s1384_s18, 3 }
  0x27   : > { %s272_s8 = sand.u32 1, %s1360_s12   ;;  %p876_p3 = scmp.ge.s32.totalorder %s1384_s18, 1 }
  0x28   : > { %s1965_s27 = scalar_select %p1529_p11, 1, 0 }
  0x29   : > { %s858_s28 = sadd.s32 4294967295, %s89_s22  ;;  %s868_s10 = sshll.u32 %s272_s8, 6 }
  0x2a   : > { %1966 = sst [smem:[#allocation30_spill]] %s1965_s27  ;;  %p859_p13 = scmp.gt.s32.totalorder %s858_s28, 0 }
  0x2b   : > { %s860_s30 = sadd.s32 4294967295, %s95_s25  ;;  %s274_s6 = scalar_lea.vmem [#allocation9], %s868_s10 }
  0x2c   : > { %s2035_s28 = smov (%p859_p13, %s858_s28), 0  ;;  %p861_p0 = scmp.gt.s32.totalorder %s860_s30, 0 }
  0x2d   : > { %s93_s7 = sadd.s32 %s2035_s28, %s88_s21  ;;  %s287_s4 = sshll.u32 %s274_s6, 4  ;;  %s1538_s4 = int_to_ptr.vmem [resolvable:$true] %s287_s4 }
  0x2e   : > { %s2037_s30 = smov (%p861_p0, %s860_s30), 0  ;;  %p1544_p2 = pnand %p1941_p12, %p1523_p10 }
  0x2f   : > { %s975_s22 = scalar_select %p1523_p10, [#allocation4], [#allocation15] }
  0x30   : > { %s99_s29 = sadd.s32 %s2037_s30, %s94_s24  ;;  %p328_p4 = scmp.lt.s32.totalorder %s1384_s18, 4 }
  0x31   : > { %s100_s25 = ssub.s32 %s93_s7, %s99_s29  ;;  %s2039_s22 = smov (!%p1941_p12, %s975_s22), [#allocation19] }
  0x32   : > { %p101_p1 = scmp.eq.s32.totalorder %s100_s25, 0  ;;  %p1564_p5 = pnand %p876_p3, %p328_p4 }
  0x33   : > { %s976_s28 = scalar_select %p1523_p10, %s1380_s17, 0 }
  0x34   : > { %s1552_s8 = scalar_select %p101_p1, %s1360_s12, %s103_s23  }
  0x35   : > { %s2041_s28 = smov (!%p1941_p12, %s976_s28), 0  ;;  %s1569_s29 = sld [smem:[#allocation4 + %s1380_s17]] }
  0x36   : > { %1968 = sst [smem:[#allocation31_spill]] %s1552_s8  ;;  %p72_p9 = scmp.ne.s32.totalorder %s1372_s15, %s1368_s14 }
  0x37   : > { %s977_s6 = scalar_select %p1523_p10, [#allocation5], [#allocation16] }
  0x38   : > { %s275_s7 = sld [smem:[%s2039_s22 + %s2041_s28]]  ;;  %p1585_p10 = por %p1940_p6, %p72_p9 }
  0x39   : > { %s2043_s6 = smov (!%p1941_p12, %s977_s6), [#allocation20]  ;;  %s1573_s10 = sld [smem:[#allocation5 + %s1380_s17]] }
  0x3a   : > { %s276_s23 = sld [smem:[%s2043_s6 + %s2041_s28]]  ;;  %p1164_p3 = pneg %p1544_p2 }
  0x3b   : > { %s1969_s24 = scalar_select %p1564_p5, 1, 0 }
  0x3c   : > { %s1576_s22 = sld [smem:[#allocation4 + %s2033_s20]] }
  0x3d   : > { %1970 = sst [smem:[#allocation32_spill]] %s1969_s24  ;;  %s1974_s24 = sand.u32 1, %s1384_s18  }
  0x3e   : > { %s1579_s25 = sld [smem:[#allocation5 + %s2033_s20]]  ;;  %s1606_s5 = scalar_lea.sflag [#allocation10], %s1974_s24 }
  0x3f   : > { %s1971_s28 = scalar_select %p1585_p10, 1, 0 }
  0x40   : > { %s869_s26 = sadd.s32 4294967295, %s276_s23  ;;  %s1944_s8 = sadd.s32 4294967295, %s1573_s10 }
  0x41   : > { %p870_p8 = scmp.gt.s32.totalorder %s869_s26, 0  ;;  %s1972_s3 = sld [smem:[#allocation35_spill]] }
  0x42   : > { %p1600_p0 = scmp.gt.s32.totalorder %s1944_s8, 0 }
  0x43   : > { %s2045_s26 = smov (%p870_p8, %s869_s26), 0 }
  0x44   : > { %s280_s6 = sadd.s32 %s2045_s26, %s275_s7 }
  0x45   : > { %s909_s30 = sshll.u32 %s280_s6, 10 }
  0x46   : > { %s1973_s11 = scalar_select %p1600_p0, 1, 0 }
  0x47   : > { %s1596_s27 = scalar_lea.hbm %s1972_s3, %s909_s30  ;;  %s1167_s30 = scalar_lea.hbm %s1972_s3, 3072 }
  0x48   : > { %s1162_s7 = scalar_lea.hbm %s1596_s27, 1024  ;;  %p1168_p9 = scmp.lt.s32.totalorder %s1596_s27, %s1972_s3 }
  0x49   : > { %p1163_p1 = scmp.ne.s32.totalorder %s1596_s27, %s1162_s7  ;;  %p1169_p6 = scmp.lt.s32.totalorder %s1167_s30, %s1162_s7 }
  0x4b   : > { %p1165_p4 = pnand %p1164_p3, %p1163_p1  ;;  %p1170_p12 = por %p1169_p6, %p1168_p9 }
  0x4d   : > { %p1166_p8 = pneg %p1165_p4 }
  0x4f   : > { %p1171_p7 = pnand %p1170_p12, %p1166_p8 }
  0x51   : > { %1174 = shalt.err (!%p1171_p7)
}
  0x52   : > { %s1175_s24 = scalar_lea.vmem %s1538_s4, 1024  ;;  %s1388_s23 = smov [#allocation9]  }
  0x53   : > { %p1176_p13 = scmp.ne.s32.totalorder %s1538_s4, %s1175_s24  ;;  %s1180_s8 = sshll.u32 %s1388_s23, 4  ;;  %s1181_s8 = int_to_ptr.vmem [resolvable:$false] %s1180_s8 }
  0x54   : > { %s1182_s12 = scalar_lea.vmem %s1181_s8, 2048  ;;  %p1183_p4 = scmp.lt.s32.totalorder %s1538_s4, %s1181_s8 }
  0x55   : > { %p1178_p11 = pnand %p1176_p13, %p1164_p3  ;;  %p1184_p5 = scmp.lt.s32.totalorder %s1182_s12, %s1175_s24 }
  0x57   : > { %p1179_p1 = pneg %p1178_p11  ;;  %p1185_p10 = por %p1184_p5, %p1183_p4 }
  0x59   : > { %p1186_p0 = pnand %p1185_p10, %p1179_p1 }
  0x5b   : > { %1189 = shalt.err (!%p1186_p0)
}
  0x5c   : > { %s1946_s7 = smov 64   ;;  %s1948_s8 = smov 4  }
  0x5d   : > { %1000 = dma.hbm_to_vmem [thread:$0]  (!%p1544_p2), %s1596_s27, 1024, %s1538_s4, %s1606_s5, %s1946_s7, %s1946_s7, %s1948_s8  }
  0x5e   : > { %s1975_s23 = sadd.s32 4294967295, %s1573_s10  ;;  %p1976_p6 = scmp.ne.s32.totalorder %s1973_s11, 0 }
  0x5f   : > { %s856_s16 = sadd.s32 4294967295, %s1579_s25  ;;  %p1977_p7 = scmp.ne.s32.totalorder %s1368_s14, %s1364_s13 }
  0x60   : > { %s2047_s23 = smov (%p1976_p6, %s1975_s23), 0  ;;  %p1978_p11 = scmp.eq.s32.totalorder %s1506_s19, 0 }
  0x61   : > { %s55_s21 = sadd.s32 %s2047_s23, %s1569_s29  ;;  %p857_p5 = scmp.gt.s32.totalorder %s856_s16, 0 }
  0x62   : > { %p1640_p12 = por %p1978_p11, %p1977_p7  ;;  %s1980_s4 = sand.u32 1, %s1372_s15  }
  0x63   : > { %s864_s27 = sshll.u32 %s1980_s4, 3  ;;  %s2049_s16 = smov (%p857_p5, %s856_s16), 0 }
  0x64   : > { %s1979_s30 = scalar_select %p1640_p12, 1, 0 }
  0x65   : > { %p1981_p2 = scmp.ne.s32.totalorder %s1971_s28, 0  ;;  %p1982_p10 = scmp.lt.s32.totalorder %s1384_s18, 3 }
  0x66   : > { %s61_s13 = sadd.s32 %s2049_s16, %s1576_s22  ;;  %s248_s10 = scalar_lea.vmem [#allocation6], %s864_s27 }
  0x67   : > { %p1651_p13 = pnand %p1982_p10, %p1981_p2  ;;  %s260_s25 = sshll.u32 %s248_s10, 4  ;;  %s1656_s25 = int_to_ptr.vmem [resolvable:$true] %s260_s25 }
  0x68   : > { %s62_s29 = ssub.s32 %s55_s21, %s61_s13  ;;  %s1984_s6 = sadd.s32 1, %s1372_s15 }
  0x69   : > { %p63_p0 = scmp.eq.s32.totalorder %s62_s29, 0  ;;  %p1986_p3 = pmov %p1982_p10 }
  0x6a   : > { %s970_s26 = scalar_select %p1981_p2, [#allocation4], [#allocation13] }
  0x6b   : > { %s1663_s24 = scalar_select %p63_p0, %s1372_s15, %s1984_s6  }
  0x6c   : > { %s971_s22 = scalar_select %p1981_p2, %s1380_s17, 0 }
  0x6d   : > { %1985 = sst [smem:[#allocation33_spill]] %s1663_s24  ;;  %s2051_s26 = smov (!%p1986_p3, %s970_s26), [#allocation17] }
  0x6e   : > { %p1987_p8 = pmov %p1986_p3  ;;  %p1988_p9 = pmov %p1986_p3 }
  0x6f   : > { %s972_s12 = scalar_select %p1981_p2, [#allocation5], [#allocation14] }
  0x70   : > { %s2053_s22 = smov (!%p1987_p8, %s971_s22), 0  ;;  %s853_s21 = sadd.s32 4294967294, %s1384_s18  }
  0x71   : > { %s249_s23 = sld [smem:[%s2051_s26 + %s2053_s22]]  ;;  %s2055_s12 = smov (!%p1988_p9, %s972_s12), [#allocation18] }
  0x72   : > { %s250_s16 = sld [smem:[%s2055_s12 + %s2053_s22]]  ;;  %s152_s4 = ssub.s32 %s1380_s17, %s2033_s20 }
  0x73   : > { %s155_s27 = sadd.s32 1, %s1348_s9  ;;  %p153_p1 = scmp.eq.s32.totalorder %s152_s4, 0 }
  0x74   : > { %p162_p4 = scmp.ne.s32.totalorder %s1348_s9, %s1344_s1  ;;  %p168_p6 = scmp.ne.s32.totalorder %s1344_s1, %s1340_s0 }
  0x75   : > { %p218_p7 = scmp.eq.s32.totalorder %s1506_s19, 2  ;;  %p1989_p11 = scmp.eq.s32.totalorder %s1384_s18, 0 }
  0x76   : > { %p1991_p10 = scmp.eq.s32.totalorder %s1506_s19, 0  ;;  %p224_p8 = scmp.eq.s32.totalorder %s853_s21, 2 }
  0x77   : > { %p1687_p5 = por %p162_p4, %p1989_p11  ;;  %p1703_p3 = por %p218_p7, %p162_p4 }
  0x78   : > { %s865_s13 = sadd.s32 4294967295, %s250_s16  ;;  %p1696_p0 = por %p168_p6, %p1991_p10 }
  0x79   : > { %s1990_s28 = scalar_select %p1687_p5, 1, 0 }
  0x7a   : > { %p866_p2 = scmp.gt.s32.totalorder %s865_s13, 0  ;;  %s305_s22 = sand.u32 1, %s1348_s9  }
  0x7b   : > { %s1992_s10 = scalar_select %p1696_p0, 1, 0 }
  0x7c   : > { %s1701_s29 = scalar_select %p153_p1, %s1348_s9, %s155_s27  }
  0x7d   : > { %s2057_s13 = smov (%p866_p2, %s865_s13), 0  ;;  %p1711_p9 = por %p224_p8, %p168_p6 }
  0x7e   : > { %s1993_s26 = scalar_select %p1703_p3, 1, 0 }
  0x7f   : > { %s254_s6 = sadd.s32 %s2057_s13, %s249_s23  ;;  %s1995_s2 = sld [smem:[#allocation34_spill]] }
  0x80   : > { %s867_s12 = sshll.u32 %s254_s6, 6  ;;  %s1720_s27 = sshll.u32 %s305_s22, 6 }
  0x81   : > { %s1994_s16 = scalar_select %p1711_p9, 1, 0 }
  0x82   : > { %s1996_s3 = sand.u32 1, %s1372_s15   ;;  %p1192_p4 = pneg %p1651_p13 }
  0x83   : > { %s1724_s21 = scalar_lea.sflag [#allocation7], %s1996_s3 }
  0x85   : > { %s1718_s8 = scalar_lea.hbm %s1995_s2, %s867_s12  ;;  %s1195_s7 = scalar_lea.hbm %s1995_s2, 384 }
  0x86   : > { %s1190_s23 = scalar_lea.hbm %s1718_s8, 128  ;;  %p1196_p11 = scmp.lt.s32.totalorder %s1718_s8, %s1995_s2 }
  0x87   : > { %p1191_p1 = scmp.ne.s32.totalorder %s1718_s8, %s1190_s23  ;;  %p1197_p2 = scmp.lt.s32.totalorder %s1195_s7, %s1190_s23 }
  0x89   : > { %p1193_p6 = pnand %p1192_p4, %p1191_p1  ;;  %p1198_p10 = por %p1197_p2, %p1196_p11 }
  0x8b   : > { %p1194_p7 = pneg %p1193_p6 }
  0x8d   : > { %p1199_p8 = pnand %p1198_p10, %p1194_p7 }
  0x8f   : > { %1202 = shalt.err (!%p1199_p8)
}
  0x90   : > { %s1203_s3 = scalar_lea.vmem %s1656_s25, 128  ;;  %s1391_s22 = smov [#allocation6]  }
  0x91   : > { %p1204_p9 = scmp.ne.s32.totalorder %s1656_s25, %s1203_s3  ;;  %s1208_s20 = sshll.u32 %s1391_s22, 4  ;;  %s1209_s20 = int_to_ptr.vmem [resolvable:$false] %s1208_s20 }
  0x92   : > { %s1210_s13 = scalar_lea.vmem %s1209_s20, 256  ;;  %p1211_p6 = scmp.lt.s32.totalorder %s1656_s25, %s1209_s20 }
  0x93   : > { %p1206_p3 = pnand %p1204_p9, %p1192_p4  ;;  %p1212_p0 = scmp.lt.s32.totalorder %s1210_s13, %s1203_s3 }
  0x95   : > { %p1207_p1 = pneg %p1206_p3  ;;  %p1213_p12 = por %p1212_p0, %p1211_p6 }
  0x97   : > { %p1214_p5 = pnand %p1213_p12, %p1207_p1 }
  0x99   : > { %1217 = shalt.err (!%p1214_p5)
}
  0x9a   : > { %s1392_s23 = smov 192   ;;  %s1997_s6 = smov 4  }
  0x9b   : > { %s1998_s7 = smov 64   ;;  %s910_s12 = sshll.u32 %s1380_s17, 10 }
  0x9c   : > { %993 = dma.hbm_to_vmem [thread:$0]  (!%p1651_p13), %s1718_s8, 128, %s1656_s25, %s1724_s21, %s1392_s23, %s1998_s7, %s1997_s6  }
  0x9d   : > { %s1999_s3 = sld [smem:[#allocation37_spill]]  ;;  %s307_s13 = scalar_lea.vmem [#allocation11], %s1720_s27 }
  0x9e   : > { %s314_s2 = sshll.u32 %s307_s13, 4  ;;  %p2000_p12 = scmp.ne.s32.totalorder %s1990_s28, 0  ;;  %s315_s2 = int_to_ptr.vmem [resolvable:$true] %s314_s2 }
  0x9f   : > { %p2001_p5 = scmp.lt.s32.totalorder %s1384_s18, 3  ;;  %s1231_s24 = scalar_lea.vmem %s315_s2, 1024 }
  0xa0   : > { %p1232_p9 = scmp.ne.s32.totalorder %s315_s2, %s1231_s24  ;;  %s1393_s8 = smov [#allocation11]  }
  0xa1   : > { %p1756_p0 = pnand %p2001_p5, %p2000_p12  ;;  %s1236_s25 = sshll.u32 %s1393_s8, 4  ;;  %s1237_s25 = int_to_ptr.vmem [resolvable:$false] %s1236_s25 }
  0xa2   : > { %s1238_s21 = scalar_lea.vmem %s1237_s25, 2048  ;;  %p1239_p7 = scmp.lt.s32.totalorder %s315_s2, %s1237_s25 }
  0xa3   : > { %s313_s22 = scalar_lea.hbm %s1999_s3, %s910_s12  ;;  %p1220_p3 = pneg %p1756_p0 }
  0xa4   : > { %p1240_p11 = scmp.lt.s32.totalorder %s1238_s21, %s1231_s24 }
  0xa5   : > { %p1234_p13 = pnand %p1232_p9, %p1220_p3 }
  0xa6   : > { %p1241_p2 = por %p1240_p11, %p1239_p7 }
  0xa7   : > { %p1235_p4 = pneg %p1234_p13 }
  0xa9   : > { %p1242_p10 = pnand %p1241_p2, %p1235_p4 }
  0xab   : > { %1245 = shalt.err (!%p1242_p10)
}
  0xac   : > { %1003 = dma.hbm_to_vmem [thread:$0]  (!%p1756_p0), %s313_s22, 1024, %s315_s2, %s1606_s5, %s1998_s7, %s1998_s7, %s1997_s6  }
  0xad   : > { %s2003_s28 = sld [smem:[#allocation32_spill]] }
  0xb3   : > { %p2004_p8 = scmp.ne.s32.totalorder %s2003_s28, 0 }
  0xb4   : > { %s334_s27 = sand.u32 (!%p2004_p8), 1, %s1368_s14   ;;  %p2005_p1 = scmp.ne.s32.totalorder (!%p2004_p8), %s1979_s30, 0 }
  0xb5   : > { %332 = sbr.rel (%p2004_p8) target bundleno = 732 (0x2dc), region = 40  ;;  %s1771_s23 = sshll.u32 (!%p2004_p8), %s334_s27, 3 }
  0xb6   : > { %s335_s24 = scalar_lea.sflag (!%p2004_p8), [#allocation7], %s334_s27  ;;  %s338_s12 = scalar_lea.vmem (!%p2004_p8), [#allocation6], %s1771_s23 }
  0xba   : > { %1323 = dma.done.wait (%p2005_p1), %s335_s24, 128  }
  0xbb   : > { %1325 = vsyncadd (%p2005_p1), %s335_s24, 4294967168  ;;  %s2006_s4 = sld [smem:[#allocation26_spill]]  ;;  %s343_s2 = sand.u32 1, %s1506_s19  }
  0xbc   : > { %s2007_s20 = sld [smem:[#allocation30_spill]]  ;;  %s344_s7 = scalar_lea.sflag [#allocation10], %s343_s2 }
  0xc1   : > { %s345_s5 = sand.u32 1, %s2006_s4  }
  0xc2   : > { %s878_s6 = sshll.u32 %s345_s5, 6  ;;  %p2008_p6 = scmp.ne.s32.totalorder %s2007_s20, 0 }
  0xc3   : > { %s1780_s3 = scalar_lea.vmem [#allocation9], %s878_s6 }
  0xc4   : > { %1327 = dma.done.wait (%p2008_p6), %s344_s7, 1024  }
  0xc5   : > { %1329 = vsyncadd (%p2008_p6), %s344_s7, 4294966272  ;;  %s1787_s22 = sand.u32 1, %s1344_s1   ;;  %p2009_p12 = scmp.ne.s32.totalorder %s1992_s10, 0 }
  0xc6   : > { %s879_s30 = sshll.u32 %s1787_s22, 6 }
  0xc7   : > { %s1790_s13 = scalar_lea.vmem [#allocation11], %s879_s30 }
  0xc8   : > { %1331 = dma.done.wait (%p2009_p12), %s344_s7, 1024  }
  0xc9   : > { %1333 = vsyncadd (%p2009_p12), %s344_s7, 4294966272  ;;  %s2010_s19 = sld [smem:[#allocation28_spill]]  ;;  %s880_s11 = sshll.u32 %s1787_s22, 4  ;;  %v1394_v0 = vmov 0.0  }
  0xca   : > { %423 = vst [vmem:[#allocation2] sm:$0xff] %v1394_v0  ;;  %424 = vst [vmem:[#allocation2 + $0x8] sm:$0xff] %v1394_v0  ;;  %s2011_s28 = sld [smem:[#allocation36_spill]]  ;;  %s1812_s2 = scalar_lea.vmem [#allocation12], %s880_s11 }
  0xcb   : > { %s2012_s4 = sld [smem:[#allocation38_spill]] }
  0xcf   : > { %p412_p5 = scmp.lt.s32.totalorder %s2010_s19, 2  ;;  %s425_s8 = sld [smem:[#allocation5 + %s2010_s19]] }
  0xd1   : > { %s2059_s19 = smov (!%p412_p5, %s2010_s19), 2 }
  0xd2   : > { %s414_s10 = scalar_lea.vmem %s2011_s28, %s2059_s19  ;;  %s417_s20 = scalar_lea.vmem %s2012_s4, %s2059_s19 }
  0xd5   : > { %p882_p0 = scmp.le.s32.totalorder %s425_s8, 0 }
  0xd7   : > { %429 = sbr.rel (%p882_p0) target bundleno = 453 (0x1c5), region = 60 }
  0xdc   : > { %v1117_v1 = vld [vmem:[%s1780_s3 + $0x38] sm:$0xff]   ;;  %v1395_v2 = vmov 0.0   ;;  %v1118_v3 = vld [vmem:[%s1780_s3 + $0x30] sm:$0xff]   ;;  %vm1396_vm0 = vmmov 0   ;;  %v1119_v4 = vld [vmem:[%s1780_s3 + $0x28] sm:$0xff]  }
  0xdd   : > { %930 = vmatprep.subr.bf16.mxu0 %v1395_v2  ;;  %946 = vmatprep.mubr.msk.bf16.mxu0 %vm1396_vm0, %v1395_v2  ;;  %v1120_v5 = vld [vmem:[%s1780_s3 + $0x20] sm:$0xff]   ;;  %v1121_v6 = vld [vmem:[%s1780_s3 + $0x18] sm:$0xff]   ;;  %v1122_v7 = vld [vmem:[%s1780_s3 + $0x10] sm:$0xff]  }
  0xde   : > { %931 = vmatpush3.bf16.msra.mxu0 %v1117_v1  ;;  %v1123_v8 = vld [vmem:[%s1780_s3 + $0x8] sm:$0xff]   ;;  %v1124_v9 = vld [vmem:[%s1780_s3] sm:$0xff]   ;;  %v1125_v10 = vld [vmem:[%s338_s12] sm:$0xff]  }
  0xdf   : > { %932 = vmatprep.subr.bf16.mxu0 %v1395_v2  ;;  %v430_v11 = vld [vmem:[#allocation2] sm:$0xff]  ;;  %v431_v15 = vld [vmem:[#allocation2 + $0x8] sm:$0xff] }
  0xe2   : > { %933 = vmatpush3.bf16.msra.mxu0 %v1118_v3 }
  0xe3   : > { %934 = vmatprep.subr.bf16.mxu0 %v1395_v2 }
  0xe6   : > { %935 = vmatpush3.bf16.msra.mxu0 %v1119_v4 }
  0xe7   : > { %936 = vmatprep.subr.bf16.mxu0 %v1395_v2 }
  0xea   : > { %937 = vmatpush3.bf16.msra.mxu0 %v1120_v5 }
  0xeb   : > { %938 = vmatprep.subr.bf16.mxu0 %v1395_v2 }
  0xee   : > { %939 = vmatpush3.bf16.msra.mxu0 %v1121_v6 }
  0xef   : > { %940 = vmatprep.subr.bf16.mxu0 %v1395_v2 }
  0xf2   : > { %941 = vmatpush3.bf16.msra.mxu0 %v1122_v7 }
  0xf3   : > { %942 = vmatprep.subr.bf16.mxu0 %v1395_v2 }
  0xf6   : > { %943 = vmatpush3.bf16.msra.mxu0 %v1123_v8 }
  0xf7   : > { %944 = vmatprep.subr.bf16.mxu0 %v1395_v2 }
  0xfa   : > { %945 = vmatpush3.bf16.msra.mxu0 %v1124_v9 }
  0xfd   : > { %947 = vmatmul.mubr.bf16.vlgmr.msra.gmra.mxu0 %v1125_v10 }
 0x1bd   : > { %v538_v12 = vpop.f32.mrf.mxu0 }
 0x1be   : > { %v545_v13 = vadd.f32 %v538_v12, %v430_v11 }
 0x1bf   : > { %v948_v14 = vpop.f32.mrf.mxu0 }
 0x1c0   : > { %547 = vst [vmem:[#allocation2] sm:$0xff] %v545_v13 }
 0x1c1   : > { %v541_v16 = vpop.f32.mrf.mxu0 }
 0x1c2   : > { %v546_v17 = vadd.f32 %v541_v16, %v431_v15 }
 0x1c3   : > { %v949_v18 = vpop.f32.mrf.mxu0 }
 0x1c4   : > { %548 = vst [vmem:[#allocation2 + $0x8] sm:$0xff] %v546_v17 }
 0x1c5 PF: > { %950 = vmatprep.subr.bf16.mxu0 %v1394_v0  ;;  %v1126_v19 = vld [vmem:[%s1790_s13 + $0x38] sm:$0xff]   ;;  %vm1397_vm1 = vmmov 0   ;;  %v1127_v20 = vld [vmem:[%s1790_s13 + $0x30] sm:$0xff]   ;;  %v1128_v21 = vld [vmem:[%s1790_s13 + $0x28] sm:$0xff]   ;;  %s2015_s30 = sld [smem:[#allocation28_spill]]  ;;  %s708_s19 = sshll.u32 %s1812_s2, 4  ;;  %s1859_s19 = int_to_ptr.vmem [resolvable:$true] %s708_s19 }
 0x1c6   : > { %966 = vmatprep.mubr.msk.bf16.mxu0 %vm1397_vm1, %v1394_v0  ;;  %951 = vmatpush3.bf16.msra.mxu0 %v1126_v19  ;;  %v1129_v22 = vld [vmem:[%s1790_s13 + $0x20] sm:$0xff]   ;;  %v1130_v23 = vld [vmem:[%s1790_s13 + $0x18] sm:$0xff]   ;;  %v1131_v24 = vld [vmem:[%s1790_s13 + $0x10] sm:$0xff]   ;;  %s2016_s25 = sld [smem:[#allocation39_spill]]  ;;  %s695_s28 = scalar_lea.sflag [#allocation8], %s1787_s22 }
 0x1c7   : > { %952 = vmatprep.subr.bf16.mxu0 %v1394_v0  ;;  %v552_v25 = vld [vmem:[#allocation2] sm:$0xff]  ;;  %v892_v27 = vld [vmem:[%s414_s10] ss:$0 sm:$0xff]  ;;  %v1132_v30 = vld [vmem:[%s1790_s13 + $0x8] sm:$0xff]   ;;  %s1246_s10 = scalar_lea.vmem %s1859_s19, 256  ;;  %p2017_p9 = scmp.ne.s32.totalorder %s1993_s26, 0 }
 0x1c8   : > { %v561_v28 = vadd.f32 %v892_v27, %v552_v25  ;;  %v1133_v33 = vld [vmem:[%s1790_s13] sm:$0xff]   ;;  %v893_v35 = vld [vmem:[%s417_s20] ss:$0 sm:$0xff]  ;;  %p1247_p3 = scmp.ne.s32.totalorder %s1859_s19, %s1246_s10  ;;  %s1398_s27 = smov [#allocation12]  }
 0x1c9   : > { %s1250_s24 = sshll.u32 %s1398_s27, 4  ;;  %s1251_s24 = int_to_ptr.vmem [resolvable:$false] %s1250_s24 }
 0x1ca   : > { %953 = vmatpush3.bf16.msra.mxu0 %v1127_v20  ;;  %v563_v31 = vmax.f32 %v561_v28, 0.0  ;;  %p1248_p13 = pnand %p1247_p3, %p2017_p9  ;;  %s1252_s4 = scalar_lea.vmem %s1251_s24, 512 }
 0x1cb   : > { %954 = vmatprep.subr.bf16.mxu0 %v1394_v0  ;;  %v553_v26 = vld [vmem:[#allocation2 + $0x8] sm:$0xff]  ;;  %s911_s13 = sshll.u32 %s2015_s30, 8  ;;  %p1253_p7 = scmp.lt.s32.totalorder %s1859_s19, %s1251_s24 }
 0x1cc   : > { %v562_v29 = vadd.f32 %v892_v27, %v553_v26  ;;  %s1857_s21 = scalar_lea.hbm %s2016_s25, %s911_s13  ;;  %p1249_p4 = pneg %p1248_p13 }
 0x1cd   : > { %p1254_p11 = scmp.lt.s32.totalorder %s1252_s4, %s1246_s10 }
 0x1ce   : > { %955 = vmatpush3.bf16.msra.mxu0 %v1128_v21  ;;  %v564_v32 = vmax.f32 %v562_v29, 0.0 }
 0x1cf   : > { %956 = vmatprep.subr.bf16.mxu0 %v1394_v0  ;;  %p1255_p2 = por %p1254_p11, %p1253_p7 }
 0x1d0   : > { %v565_v34 = vpack.c.bf16 %v564_v32, %v563_v31 }
 0x1d1   : > { %p1256_p10 = pnand %p1255_p2, %p1249_p4 }
 0x1d2   : > { %957 = vmatpush3.bf16.msra.mxu0 %v1129_v22 }
 0x1d3   : > { %958 = vmatprep.subr.bf16.mxu0 %v1394_v0 }
 0x1d6   : > { %959 = vmatpush3.bf16.msra.mxu0 %v1130_v23 }
 0x1d7   : > { %960 = vmatprep.subr.bf16.mxu0 %v1394_v0 }
 0x1da   : > { %961 = vmatpush3.bf16.msra.mxu0 %v1131_v24 }
 0x1db   : > { %962 = vmatprep.subr.bf16.mxu0 %v1394_v0 }
 0x1de   : > { %963 = vmatpush3.bf16.msra.mxu0 %v1132_v30 }
 0x1df   : > { %964 = vmatprep.subr.bf16.mxu0 %v1394_v0 }
 0x1e2   : > { %965 = vmatpush3.bf16.msra.mxu0 %v1133_v33 }
 0x1e5   : > { %967 = vmatmul.mubr.bf16.vlgmr.msra.gmra.mxu0 %v565_v34 }
 0x2a5   : > { %v671_v36 = vpop.f32.mrf.mxu0 }
 0x2a6   : > { %v672_v37 = vadd.f32 %v893_v35, %v671_v36 }
 0x2a7   : > { %v968_v38 = vpop.f32.mrf.mxu0 }
 0x2a8   : > { %v902_v39 = vmul.f32 -1.442695, %v672_v37 }
 0x2a9   : > { %v674_v40 = vpop.f32.mrf.mxu0 }
 0x2aa   : > { %1134 = vpow2.f32 %v902_v39  ;;  %v675_v41 = vadd.f32 %v893_v35, %v674_v40 }
 0x2ab   : > { %v969_v42 = vpop.f32.mrf.mxu0 }
 0x2ac   : > { %v903_v43 = vmul.f32 -1.442695, %v675_v41 }
 0x2ae   : > { %1136 = vpow2.f32 %v903_v43 }
 0x2b7   : > { %v1135_v44 = vpop.eup %1134 }
 0x2b8   : > { %v684_v45 = vadd.f32 1.0, %v1135_v44 }
 0x2ba   : > { %1138 = vrcp.f32 %v684_v45 }
 0x2bb   : > { %v1137_v46 = vpop.eup %1136 }
 0x2bc   : > { %v685_v47 = vadd.f32 1.0, %v1137_v46 }
 0x2be   : > { %1140 = vrcp.f32 %v685_v47 }
 0x2c7   : > { %v1139_v48 = vpop.eup %1138 }
 0x2c8   : > { %v690_v49 = vmul.f32 0.33333334, %v1139_v48 }
 0x2ca   : > { %692 = vst [vmem:[%s1812_s2] sm:$0xff] %v690_v49 }
 0x2cb   : > { %v1141_v50 = vpop.eup %1140 }
 0x2cc   : > { %v691_v51 = vmul.f32 0.33333334, %v1141_v50 }
 0x2ce   : > { %693 = vst [vmem:[%s1812_s2 + $0x8] sm:$0xff] %v691_v51 }
 0x2cf   : > { %1259 = shalt.err (!%p1256_p10)
}
 0x2d0   : > { %s1260_s20 = scalar_lea.hbm %s1857_s21, 256  ;;  %s1264_s12 = scalar_lea.hbm %s2016_s25, 768 }
 0x2d1   : > { %p1261_p8 = scmp.ne.s32.totalorder %s1857_s21, %s1260_s20  ;;  %p1265_p12 = scmp.lt.s32.totalorder %s1857_s21, %s2016_s25 }
 0x2d2   : > { %p1266_p5 = scmp.lt.s32.totalorder %s1264_s12, %s1260_s20 }
 0x2d3   : > { %p1262_p1 = pnand %p1261_p8, %p2017_p9 }
 0x2d4   : > { %p1267_p0 = por %p1266_p5, %p1265_p12 }
 0x2d5   : > { %p1263_p6 = pneg %p1262_p1 }
 0x2d7   : > { %p1268_p3 = pnand %p1267_p0, %p1263_p6 }
 0x2d9   : > { %1271 = shalt.err (!%p1268_p3)
}
 0x2da   : > { %s1399_s7 = smov 128   ;;  %s1400_s3 = smov 8  }
 0x2db   : > { %984 = dma.vmem_to_hbm [thread:$0]  (%p2017_p9), %s1859_s19, 256, %s1857_s21, %s695_s28, %s1399_s7, %s1399_s7, %s1400_s3  }
 0x2dc PF: > { %p1009_p13 = scmp.ge.s32.totalorder %s1384_s18, 2  ;;  %s723_s30 = sand.u32 1, %s1340_s0  }
 0x2dd   : > { %p2018_p4 = scmp.ne.s32.totalorder %s1994_s16, 0  ;;  %s724_s13 = scalar_lea.sflag [#allocation8], %s723_s30 }
 0x2df   : > { %p1005_p7 = pnand %p1009_p13, %p2018_p4 }
 0x2e1   : > { %p1006_p11 = pneg %p1005_p7 }
 0x2e3   : > { %1335 = dma.done.wait (%p1006_p11), %s724_s13, 256  }
 0x2e4   : > { %1337 = vsyncadd (%p1006_p11), %s724_s13, 4294967040  ;;  %s34_s18 = sadd.s32 1, %s1384_s18   ;;  %s2019_s10 = sld [smem:[#allocation26_spill]] }
 0x2e5   : > { %p31_p2 = scmp.ge.s32.totalorder %s34_s18, 5   ;;  %s2020_s11 = sld [smem:[#allocation27_spill]] }
 0x2e6   : > { %s2021_s12 = sld [smem:[#allocation31_spill]]  ;;  %s2024_s0 = smov %s1344_s1 }
 0x2e7   : > { %s2022_s26 = sld [smem:[#allocation33_spill]]  ;;  %s2025_s1 = smov %s1348_s9 }
 0x2e8   : > { %s2023_s22 = sld [smem:[#allocation29_spill]]  ;;  %s2026_s9 = smov %s1701_s29 }
 0x2e9   : > { %s2027_s13 = smov %s1368_s14  ;;  %s2028_s14 = smov %s1372_s15 }
 0x2ea   : > { %s2030_s16 = smov %s1380_s17  ;;  %33 = sbr.rel (!%p31_p2) target bundleno = 29 (0x1d), region = 127 }
 0x2ed   : > { %s2029_s15 = smov %s2022_s26 }
 0x2ee   : > { %s2031_s17 = smov %s2023_s22 }
 0x2ef   :  { %729 = vsyncpa [#allocation7], 1 }
 0x2f0   :  { %731 = vsyncpa [#allocation7 + $0x1], 1 }
 0x2f1   :  { %732 = vsyncpa [#allocation10], 1 }
 0x2f2   :  { %734 = vsyncpa [#allocation10 + $0x1], 1 }
 0x2f3   :  { %735 = vsyncpa [#allocation8], 1 }
 0x2f4   :  { %737 = vsyncpa [#allocation8 + $0x1], 1 }

</bundles_post_ra>
